<compile_context>
chip_gen: v7x
topology: tpu7x:2x2x1
jax: 0.10.0
libtpu: 0.0.40
codegen_flags: <defaults>
</compile_context>

<pallas_src>
import functools

import jax
import jax.numpy as jnp
from jax.experimental import pallas as pl
from jax.experimental.pallas import tpu as pltpu

FEAT_PAD = 128  # lane-dense feature width


def _round_up(v, m):
    return ((v + m - 1) // m) * m


def _pad2(a, rows, cols):
    return jnp.pad(a, ((0, rows - a.shape[0]), (0, cols - a.shape[1])))


def _pick_tile(n_pad):
    for t in (512, 256, 128):
        if n_pad % t == 0:
            return t
    return n_pad


# --------------------------------------------------------------------------
# GINConv layer kernel: out = MLP(Ahat @ x), tiled over (rows, reduction).
# --------------------------------------------------------------------------
def gin_conv_kernel(ahat_ref, x_ref, wa_ref, ba_ref, wb_ref, bb_ref,
                    out_ref, acc_ref, *, relu_out):
    k = pl.program_id(1)

    @pl.when(k == 0)
    def _():
        acc_ref[...] = jnp.zeros_like(acc_ref)

    # bf16 x bf16 -> f32 accumulation on the MXU.
    acc_ref[...] += jnp.dot(ahat_ref[...], x_ref[...],
                            preferred_element_type=jnp.float32)

    @pl.when(k == pl.num_programs(1) - 1)
    def _():
        z = acc_ref[...].astype(jnp.bfloat16)                       # [tm, FP]
        h = jnp.dot(z, wa_ref[...],
                    preferred_element_type=jnp.float32) + ba_ref[...]
        h = jnp.maximum(h, 0.0)                                     # MLP hidden ReLU (f32)
        h = jnp.dot(h.astype(jnp.bfloat16), wb_ref[...],
                    preferred_element_type=jnp.float32) + bb_ref[...]
        if relu_out:
            h = jnp.maximum(h, 0.0)                                 # F.relu(conv1(...))
        out_ref[...] = h.astype(out_ref.dtype)


def _gin_conv(ahat, x, wa, ba, wb, bb, *, relu):
    n_pad, fp = x.shape
    tm = tk = _pick_tile(n_pad)
    grid = (n_pad // tm, n_pad // tk)
    return pl.pallas_call(
        functools.partial(gin_conv_kernel, relu_out=relu),
        out_shape=jax.ShapeDtypeStruct((n_pad, fp), jnp.bfloat16),
        grid=grid,
        in_specs=[
            pl.BlockSpec((tm, tk), lambda i, k: (i, k)),      # Ahat tile
            pl.BlockSpec((tk, fp), lambda i, k: (k, 0)),      # node features tile
            pl.BlockSpec((fp, fp), lambda i, k: (0, 0)),      # wa (resident)
            pl.BlockSpec((1, fp), lambda i, k: (0, 0)),       # ba (resident, f32)
            pl.BlockSpec((fp, fp), lambda i, k: (0, 0)),      # wb (resident)
            pl.BlockSpec((1, fp), lambda i, k: (0, 0)),       # bb (resident, f32)
        ],
        out_specs=pl.BlockSpec((tm, fp), lambda i, k: (i, 0)),
        scratch_shapes=[pltpu.VMEM((tm, fp), jnp.float32)],
        compiler_params=pltpu.CompilerParams(
            dimension_semantics=("parallel", "arbitrary")),
    )(ahat, x, wa, ba, wb, bb)


# --------------------------------------------------------------------------
# global_mean_pool + fused (lin1 -> dropout -> lin2) head kernel.
# Tiled over the node (reduction) axis; f32 accumulator; head on last step.
# --------------------------------------------------------------------------
def pool_head_kernel(pool_ref, h_ref, wl_ref, bl_ref, out_ref, acc_ref):
    k = pl.program_id(0)

    @pl.when(k == 0)
    def _():
        acc_ref[...] = jnp.zeros_like(acc_ref)

    acc_ref[...] += jnp.dot(pool_ref[...], h_ref[...],
                            preferred_element_type=jnp.float32)      # [Gp, FP]

    @pl.when(k == pl.num_programs(0) - 1)
    def _():
        g = acc_ref[...].astype(jnp.bfloat16)
        y = jnp.dot(g, wl_ref[...],
                    preferred_element_type=jnp.float32) + bl_ref[...]  # fused lin1@lin2
        out_ref[...] = y


def _pool_head(pool, h, wl, bl):
    gp, n_pad = pool.shape
    fp = h.shape[1]
    tk = _pick_tile(n_pad)
    grid = (n_pad // tk,)
    return pl.pallas_call(
        pool_head_kernel,
        out_shape=jax.ShapeDtypeStruct((gp, fp), jnp.float32),       # lane-dense slab
        grid=grid,
        in_specs=[
            pl.BlockSpec((gp, tk), lambda k: (0, k)),                # pool column tile
            pl.BlockSpec((tk, fp), lambda k: (k, 0)),                # h2 row tile
            pl.BlockSpec((fp, fp), lambda k: (0, 0)),                # fused head weight
            pl.BlockSpec((1, fp), lambda k: (0, 0)),                 # fused head bias (f32)
        ],
        out_specs=pl.BlockSpec((gp, fp), lambda k: (0, 0)),
        scratch_shapes=[pltpu.VMEM((gp, fp), jnp.float32)],
        compiler_params=pltpu.CompilerParams(
            dimension_semantics=("arbitrary",)),
    )(pool, h, wl, bl)


# --------------------------------------------------------------------------
# Forward wrapper (plain-JAX glue: adjacency / pooling matrices, padding, fusion)
# --------------------------------------------------------------------------
def gin_forward(x, edge_index, batch, params, num_graphs):
    """x: [N, F_in] f32, edge_index: [2, E] i32, batch: [N] i32."""
    n = x.shape[0]
    num_classes = params["wl2"].shape[1]

    fp = FEAT_PAD
    n_pad = _round_up(max(n, 1), 128)
    g_pad = _round_up(max(num_graphs, 1), 8)

    # Dense Ahat = A + I (A[dst, src] = 1).  Zero-padded rows/cols are inert.
    src, dst = edge_index[0], edge_index[1]
    adj = jnp.zeros((n, n), jnp.float32).at[dst, src].add(1.0)
    ahat = adj + jnp.eye(n, dtype=jnp.float32)
    ahat = _pad2(ahat, n_pad, n_pad).astype(jnp.bfloat16)

    xp = _pad2(x, n_pad, fp).astype(jnp.bfloat16)

    # Mean-pool matrix P[g, i] = 1/count_g if batch[i] == g (padded nodes -> 0).
    onehot = (batch[None, :] == jnp.arange(num_graphs)[:, None]).astype(jnp.float32)
    counts = jnp.maximum(onehot.sum(axis=1, keepdims=True), 1.0)
    pool = _pad2(onehot / counts, g_pad, n_pad).astype(jnp.bfloat16)

    # Pad MLP weights (bf16) and biases (f32) to lane-dense 128-wide blocks.
    def wpad(w):
        return _pad2(w, fp, fp).astype(jnp.bfloat16)

    def bpad(b):
        return _pad2(b, 1, fp)

    w1a, b1a = wpad(params["w1a"]), bpad(params["b1a"])
    w1b, b1b = wpad(params["w1b"]), bpad(params["b1b"])
    w2a, b2a = wpad(params["w2a"]), bpad(params["b2a"])
    w2b, b2b = wpad(params["w2b"]), bpad(params["b2b"])

    # Fuse the two head linears (dropout = identity in eval mode).
    wl_fused = params["wl1"] @ params["wl2"]                        # [out_c, classes]
    bl_fused = params["bl1"] @ params["wl2"] + params["bl2"]        # [1, classes]
    wl_fused = wpad(wl_fused)
    bl_fused = bpad(bl_fused)

    h1 = _gin_conv(ahat, xp, w1a, b1a, w1b, b1b, relu=True)         # relu(conv1(x))
    h2 = _gin_conv(ahat, h1, w2a, b2a, w2b, b2b, relu=False)        # conv2(.)
    y = _pool_head(pool, h2, wl_fused, bl_fused)                    # [Gp, 128] f32

    return y[:num_graphs, :num_classes]


def init_params(key, in_channels, hidden_channels, out_channels, num_classes):
    ks = jax.random.split(key, 8)

    def lin(k, fan_in, fan_out):
        w = jax.random.normal(k, (fan_in, fan_out), jnp.float32) * (1.0 / jnp.sqrt(fan_in))
        b = jnp.full((1, fan_out), 0.01, jnp.float32)   # biases kept 2-D for TPU layout
        return w, b

    p = {}
    p["w1a"], p["b1a"] = lin(ks[0], in_channels, hidden_channels)
    p["w1b"], p["b1b"] = lin(ks[1], hidden_channels, hidden_channels)
    p["w2a"], p["b2a"] = lin(ks[2], hidden_channels, hidden_channels)
    p["w2b"], p["b2b"] = lin(ks[3], hidden_channels, out_channels)
    p["wl1"], p["bl1"] = lin(ks[4], out_channels, out_channels // 2)
    p["wl2"], p["bl2"] = lin(ks[5], out_channels // 2, num_classes)
    return p


if __name__ == "__main__":
    key = jax.random.PRNGKey(0)
    k_x, k_p = jax.random.split(key)

    in_channels, hidden_channels, out_channels, num_classes = 8, 32, 16, 4
    num_nodes, num_graphs = 16, 2

    # Node features.
    x = jax.random.normal(k_x, (num_nodes, in_channels), jnp.float32)

    # Two ring graphs of 8 nodes each, bidirectional edges.
    edges = []
    for g in range(num_graphs):
        base = g * 8
        for i in range(8):
            a, b = base + i, base + (i + 1) % 8
            edges.append((a, b))
            edges.append((b, a))
    edge_index = jnp.array(edges, dtype=jnp.int32).T                    # [2, E]
    batch = jnp.repeat(jnp.arange(num_graphs, dtype=jnp.int32), 8)      # [N]

    params = init_params(k_p, in_channels, hidden_channels, out_channels, num_classes)

    out = gin_forward(x, edge_index, batch, params, num_graphs)
    jax.block_until_ready(out)
    assert out.shape == (num_graphs, num_classes)
    print("KERNEL_OK")
</pallas_src>

<mosaic_0001>
module attributes {stable_mosaic.version = 11 : i64} {
  func.func @gin_conv_kernel(%arg0: i32, %arg1: i32, %arg2: memref<128x128xbf16, #tpu.memory_space<vmem>>, %arg3: memref<128x128xbf16, #tpu.memory_space<vmem>>, %arg4: memref<128x128xbf16, #tpu.memory_space<vmem>>, %arg5: memref<1x128xf32, #tpu.memory_space<vmem>>, %arg6: memref<128x128xbf16, #tpu.memory_space<vmem>>, %arg7: memref<1x128xf32, #tpu.memory_space<vmem>>, %arg8: memref<128x128xbf16, #tpu.memory_space<vmem>>, %arg9: memref<128x128xf32, #tpu.memory_space<vmem>>) attributes {dimension_semantics = [#tpu.dimension_semantics<parallel>, #tpu.dimension_semantics<arbitrary>], iteration_bounds = array<i64: 1, 1>, scalar_prefetch = 0 : i64, scratch_operands = 1 : i64, tpu.core_type = #tpu.core_type<tc>, window_params = [{transform_indices = @transform_0, window_bounds = array<i64: 128, 128>}, {transform_indices = @transform_1, window_bounds = array<i64: 128, 128>}, {pipeline_mode = #tpu.pipeline_mode<synchronous>, transform_indices = @transform_2, window_bounds = array<i64: 128, 128>}, {pipeline_mode = #tpu.pipeline_mode<synchronous>, transform_indices = @transform_3, window_bounds = array<i64: 1, 128>}, {pipeline_mode = #tpu.pipeline_mode<synchronous>, transform_indices = @transform_4, window_bounds = array<i64: 128, 128>}, {pipeline_mode = #tpu.pipeline_mode<synchronous>, transform_indices = @transform_5, window_bounds = array<i64: 1, 128>}, {transform_indices = @transform_6, window_bounds = array<i64: 128, 128>}]} {
    %c0_i32 = arith.constant 0 : i32
    %0 = arith.cmpi eq, %arg1, %c0_i32 : i32
    %1 = arith.extui %0 : i1 to i32
    %c0_i32_0 = arith.constant 0 : i32
    %2 = arith.cmpi ne, %1, %c0_i32_0 : i32
    scf.if %2 {
      %cst_10 = arith.constant 0.000000e+00 : f32
      %12 = vector.broadcast %cst_10 : f32 to vector<128x128xf32>
      %c0_11 = arith.constant 0 : index
      %c0_12 = arith.constant 0 : index
      %13 = vector.load %arg9[%c0_11, %c0_12] : memref<128x128xf32, #tpu.memory_space<vmem>>, vector<128x128xf32>
      tpu.vector_store %arg9[%c0_11, %c0_12], %12 {strides = array<i32>} : memref<128x128xf32, #tpu.memory_space<vmem>>, vector<128x128xf32>,
    } else {
    }
    %c0 = arith.constant 0 : index
    %c0_1 = arith.constant 0 : index
    %3 = vector.load %arg9[%c0, %c0_1] : memref<128x128xf32, #tpu.memory_space<vmem>>, vector<128x128xf32>
    %c0_2 = arith.constant 0 : index
    %c0_3 = arith.constant 0 : index
    %4 = vector.load %arg2[%c0_2, %c0_3] : memref<128x128xbf16, #tpu.memory_space<vmem>>, vector<128x128xbf16>
    %c0_4 = arith.constant 0 : index
    %c0_5 = arith.constant 0 : index
    %5 = vector.load %arg3[%c0_4, %c0_5] : memref<128x128xbf16, #tpu.memory_space<vmem>>, vector<128x128xbf16>
    %cst = arith.constant dense<0.000000e+00> : vector<128x128xf32>
    %6 = tpu.matmul %4, %5, %cst {dimension_numbers = #tpu.dot_dimension_numbers<[1], [0], [0], [1], [0, 0, 1, 1], [], []>} : vector<128x128xbf16>, vector<128x128xbf16>, vector<128x128xf32> -> vector<128x128xf32>
    %7 = arith.addf %3, %6 : vector<128x128xf32>
    %c0_6 = arith.constant 0 : index
    %c0_7 = arith.constant 0 : index
    %8 = vector.load %arg9[%c0_6, %c0_7] : memref<128x128xf32, #tpu.memory_space<vmem>>, vector<128x128xf32>
    tpu.vector_store %arg9[%c0_6, %c0_7], %7 {strides = array<i32>} : memref<128x128xf32, #tpu.memory_space<vmem>>, vector<128x128xf32>,
    %c0_i32_8 = arith.constant 0 : i32
    %9 = arith.cmpi eq, %arg1, %c0_i32_8 : i32
    %10 = arith.extui %9 : i1 to i32
    %c0_i32_9 = arith.constant 0 : i32
    %11 = arith.cmpi ne, %10, %c0_i32_9 : i32
    scf.if %11 {
      %c0_10 = arith.constant 0 : index
      %c0_11 = arith.constant 0 : index
      %12 = vector.load %arg9[%c0_10, %c0_11] : memref<128x128xf32, #tpu.memory_space<vmem>>, vector<128x128xf32>
      %13 = arith.truncf %12 : vector<128x128xf32> to vector<128x128xbf16>
      %c0_12 = arith.constant 0 : index
      %c0_13 = arith.constant 0 : index
      %14 = vector.load %arg4[%c0_12, %c0_13] : memref<128x128xbf16, #tpu.memory_space<vmem>>, vector<128x128xbf16>
      %cst_14 = arith.constant dense<0.000000e+00> : vector<128x128xf32>
      %15 = tpu.matmul %13, %14, %cst_14 {dimension_numbers = #tpu.dot_dimension_numbers<[1], [0], [0], [1], [0, 0, 1, 1], [], []>} : vector<128x128xbf16>, vector<128x128xbf16>, vector<128x128xf32> -> vector<128x128xf32>
      %c0_15 = arith.constant 0 : index
      %c0_16 = arith.constant 0 : index
      %16 = vector.load %arg5[%c0_15, %c0_16] : memref<1x128xf32, #tpu.memory_space<vmem>>, vector<1x128xf32>
      %17 = vector.broadcast %16 : vector<1x128xf32> to vector<128x128xf32>
      %18 = arith.addf %15, %17 : vector<128x128xf32>
      %cst_17 = arith.constant 0.000000e+00 : f32
      %19 = vector.broadcast %cst_17 : f32 to vector<128x128xf32>
      %20 = arith.maximumf %18, %19 : vector<128x128xf32>
      %21 = arith.truncf %20 : vector<128x128xf32> to vector<128x128xbf16>
      %c0_18 = arith.constant 0 : index
      %c0_19 = arith.constant 0 : index
      %22 = vector.load %arg6[%c0_18, %c0_19] : memref<128x128xbf16, #tpu.memory_space<vmem>>, vector<128x128xbf16>
      %cst_20 = arith.constant dense<0.000000e+00> : vector<128x128xf32>
      %23 = tpu.matmul %21, %22, %cst_20 {dimension_numbers = #tpu.dot_dimension_numbers<[1], [0], [0], [1], [0, 0, 1, 1], [], []>} : vector<128x128xbf16>, vector<128x128xbf16>, vector<128x128xf32> -> vector<128x128xf32>
      %c0_21 = arith.constant 0 : index
      %c0_22 = arith.constant 0 : index
      %24 = vector.load %arg7[%c0_21, %c0_22] : memref<1x128xf32, #tpu.memory_space<vmem>>, vector<1x128xf32>
      %25 = vector.broadcast %24 : vector<1x128xf32> to vector<128x128xf32>
      %26 = arith.addf %23, %25 : vector<128x128xf32>
      %cst_23 = arith.constant 0.000000e+00 : f32
      %27 = vector.broadcast %cst_23 : f32 to vector<128x128xf32>
      %28 = arith.maximumf %26, %27 : vector<128x128xf32>
      %29 = arith.truncf %28 : vector<128x128xf32> to vector<128x128xbf16>
      %c0_24 = arith.constant 0 : index
      %c0_25 = arith.constant 0 : index
      %30 = vector.load %arg8[%c0_24, %c0_25] : memref<128x128xbf16, #tpu.memory_space<vmem>>, vector<128x128xbf16>
      tpu.vector_store %arg8[%c0_24, %c0_25], %29 {strides = array<i32>} : memref<128x128xbf16, #tpu.memory_space<vmem>>, vector<128x128xbf16>,
    } else {
    }
    return
  }
  func.func @transform_0(%arg0: i32, %arg1: i32) -> (i32, i32) {
    %c0_i32 = arith.constant 0 : i32
    return %arg0, %arg1 : i32, i32
  }
  func.func @transform_1(%arg0: i32, %arg1: i32) -> (i32, i32) {
    %c0_i32 = arith.constant 0 : i32
    %c0_i32_0 = arith.constant 0 : i32
    return %arg1, %c0_i32 : i32, i32
  }
  func.func @transform_2(%arg0: i32, %arg1: i32) -> (i32, i32) {
    %c0_i32 = arith.constant 0 : i32
    %c0_i32_0 = arith.constant 0 : i32
    %c0_i32_1 = arith.constant 0 : i32
    return %c0_i32, %c0_i32_0 : i32, i32
  }
  func.func @transform_3(%arg0: i32, %arg1: i32) -> (i32, i32) {
    %c0_i32 = arith.constant 0 : i32
    %c0_i32_0 = arith.constant 0 : i32
    %c0_i32_1 = arith.constant 0 : i32
    return %c0_i32, %c0_i32_0 : i32, i32
  }
  func.func @transform_4(%arg0: i32, %arg1: i32) -> (i32, i32) {
    %c0_i32 = arith.constant 0 : i32
    %c0_i32_0 = arith.constant 0 : i32
    %c0_i32_1 = arith.constant 0 : i32
    return %c0_i32, %c0_i32_0 : i32, i32
  }
  func.func @transform_5(%arg0: i32, %arg1: i32) -> (i32, i32) {
    %c0_i32 = arith.constant 0 : i32
    %c0_i32_0 = arith.constant 0 : i32
    %c0_i32_1 = arith.constant 0 : i32
    return %c0_i32, %c0_i32_0 : i32, i32
  }
  func.func @transform_6(%arg0: i32, %arg1: i32) -> (i32, i32) {
    %c0_i32 = arith.constant 0 : i32
    %c0_i32_0 = arith.constant 0 : i32
    return %arg0, %c0_i32 : i32, i32
  }
}

</mosaic_0001>

<bundles_post_ra>
// kernel: tpu_custom_call.1
= control target key start
LH: loop header
LB: loop body
LE: loop exit
PB: predicated region body
PF: predicated region fallthrough
CT: control target
= control target key end

     0   :  { %11 = vsyncpa [#allocation4], 0  ;;  %s1442_s0 = inlined_call_operand.hbm [shape: bf16[128,128], index: 0, kind: input, shape index: {}]   ;;  %s1443_s1 = inlined_call_operand.hbm [shape: bf16[128,128], index: 1, kind: input, shape index: {}]   ;;  %s1444_s2 = inlined_call_operand.hbm [shape: bf16[128,128], index: 2, kind: input, shape index: {}]   ;;  %s1445_s3 = inlined_call_operand.vmem [shape: f32[1,128], index: 3, kind: input, shape index: {}]   ;;  %s1446_s4 = inlined_call_operand.hbm [shape: bf16[128,128], index: 4, kind: input, shape index: {}]   ;;  %s1447_s5 = inlined_call_operand.vmem [shape: f32[1,128], index: 5, kind: input, shape index: {}]   ;;  %s1448_s6 = inlined_call_operand.hbm [shape: bf16[128,128], index: 6, kind: output, shape index: {}]  }
   0x1   :  { %12 = vsyncpa [#allocation7], 0 }
   0x2   :  { %13 = vsyncpa [#allocation10], 0 }
   0x3   :  { %14 = vsyncpa [#allocation5], 0  ;;  %s1305_s21 = smov [#allocation6]   ;;  %s1306_s23 = smov [#allocation3]  }
   0x4   :  { %s32_s22 = sshll.u32 %s1305_s21, 4  ;;  %s20_s24 = sshll.u32 %s1306_s23, 4  ;;  %s33_s22 = int_to_ptr.vmem [resolvable:$true] %s32_s22  ;;  %s1347_s24 = int_to_ptr.vmem [resolvable:$true] %s20_s24 }
   0x5   :  { %s1187_s27 = scalar_lea.hbm %s1443_s1, 1024 }
   0x6   :  { %p1188_p0 = scmp.ne.s32.totalorder %s1443_s1, %s1187_s27  ;;  %p1191_p1 = scmp.lt.u32.totalorder %s1187_s27, %s1443_s1 }
   0x8   :  { %p1193_p2 = pnand %p1191_p1, %p1188_p0 }
   0xa   :  { %1196 = shalt.err (!%p1193_p2)
}
   0xb   :  { %s1197_s8 = scalar_lea.vmem %s33_s22, 1024  ;;  %p1202_p4 = scmp.lt.s32.totalorder %s33_s22, %s33_s22 }
   0xc   :  { %p1198_p3 = scmp.ne.s32.totalorder %s33_s22, %s1197_s8  ;;  %p1203_p5 = scmp.lt.s32.totalorder %s1197_s8, %s1197_s8 }
   0xe   :  { %p1204_p6 = por %p1203_p5, %p1202_p4 }
  0x10   :  { %p1205_p7 = pnand %p1204_p6, %p1198_p3 }
  0x12   :  { %1208 = shalt.err (!%p1205_p7)
}
  0x13   :  { %s1307_s9 = smov 64   ;;  %s1308_s10 = smov 4  }
  0x14   :  { %38 = dma.hbm_to_vmem [thread:$0]  %s1443_s1, 1024, %s33_s22, [#allocation7], %s1307_s9, %s1307_s9, %s1308_s10  }
  0x15   :  { %s1209_s15 = scalar_lea.hbm %s1442_s0, 1024 }
  0x16   :  { %p1210_p8 = scmp.ne.s32.totalorder %s1442_s0, %s1209_s15  ;;  %p1213_p9 = scmp.lt.u32.totalorder %s1209_s15, %s1442_s0 }
  0x18   :  { %p1215_p10 = pnand %p1213_p9, %p1210_p8 }
  0x1a   :  { %1218 = shalt.err (!%p1215_p10)
}
  0x1b   :  { %s1219_s20 = scalar_lea.vmem %s1347_s24, 1024  ;;  %p1224_p12 = scmp.lt.s32.totalorder %s1347_s24, %s1347_s24 }
  0x1c   :  { %p1220_p11 = scmp.ne.s32.totalorder %s1347_s24, %s1219_s20  ;;  %p1225_p13 = scmp.lt.s32.totalorder %s1219_s20, %s1219_s20 }
  0x1e   :  { %p1226_p0 = por %p1225_p13, %p1224_p12 }
  0x20   :  { %p1227_p1 = pnand %p1226_p0, %p1220_p11 }
  0x22   :  { %1230 = shalt.err (!%p1227_p1)
}
  0x23   :  { %26 = dma.hbm_to_vmem [thread:$0]  %s1442_s0, 1024, %s1347_s24, [#allocation4], %s1307_s9, %s1307_s9, %s1308_s10  }
  0x24   :  { %s1309_s22 = smov [#allocation8]   ;;  %s1310_s25 = smov [#allocation9]  }
  0x25   :  { %s44_s23 = sshll.u32 %s1309_s22, 4  ;;  %s58_s26 = sshll.u32 %s1310_s25, 4  ;;  %s45_s23 = int_to_ptr.vmem [resolvable:$true] %s44_s23  ;;  %s1384_s26 = int_to_ptr.vmem [resolvable:$true] %s58_s26 }
  0x26   :  { %s1231_s29 = scalar_lea.hbm %s1444_s2, 1024 }
  0x27   :  { %p1232_p2 = scmp.ne.s32.totalorder %s1444_s2, %s1231_s29  ;;  %p1235_p3 = scmp.lt.u32.totalorder %s1231_s29, %s1444_s2 }
  0x29   :  { %p1237_p4 = pnand %p1235_p3, %p1232_p2 }
  0x2b   :  { %1240 = shalt.err (!%p1237_p4)
}
  0x2c   :  { %s1241_s0 = scalar_lea.vmem %s45_s23, 1024  ;;  %p1246_p6 = scmp.lt.s32.totalorder %s45_s23, %s45_s23 }
  0x2d   :  { %p1242_p5 = scmp.ne.s32.totalorder %s45_s23, %s1241_s0  ;;  %p1247_p7 = scmp.lt.s32.totalorder %s1241_s0, %s1241_s0 }
  0x2f   :  { %p1248_p8 = por %p1247_p7, %p1246_p6 }
  0x31   :  { %p1249_p9 = pnand %p1248_p8, %p1242_p5 }
  0x33   :  { %1252 = shalt.err (!%p1249_p9)
}
  0x34   :  { %50 = dma.hbm_to_vmem [thread:$0]  %s1444_s2, 1024, %s45_s23, [#allocation7], %s1307_s9, %s1307_s9, %s1308_s10  }
  0x35   :  { %s1253_s15 = scalar_lea.hbm %s1446_s4, 1024 }
  0x36   :  { %p1254_p10 = scmp.ne.s32.totalorder %s1446_s4, %s1253_s15  ;;  %p1257_p11 = scmp.lt.u32.totalorder %s1253_s15, %s1446_s4 }
  0x38   :  { %p1259_p12 = pnand %p1257_p11, %p1254_p10 }
  0x3a   :  { %1262 = shalt.err (!%p1259_p12)
}
  0x3b   :  { %s1263_s20 = scalar_lea.vmem %s1384_s26, 1024  ;;  %p1268_p0 = scmp.lt.s32.totalorder %s1384_s26, %s1384_s26 }
  0x3c   :  { %p1264_p13 = scmp.ne.s32.totalorder %s1384_s26, %s1263_s20  ;;  %p1269_p1 = scmp.lt.s32.totalorder %s1263_s20, %s1263_s20 }
  0x3e   :  { %p1270_p2 = por %p1269_p1, %p1268_p0 }
  0x40   :  { %p1271_p3 = pnand %p1270_p2, %p1264_p13 }
  0x42   :  { %1274 = shalt.err (!%p1271_p3)
}
  0x43   :  { %64 = dma.hbm_to_vmem [thread:$0]  %s1446_s4, 1024, %s1384_s26, [#allocation10], %s1307_s9, %s1307_s9, %s1308_s10  }
  0x44   :  { %1297 = dma.done.wait [#allocation4], 1024  }
  0x45   :  { %1298 = vsyncadd [#allocation4], 4294966272 }
  0x46   :  { %1299 = dma.done.wait [#allocation7], 2048  }
  0x47   :  { %1300 = vsyncadd [#allocation7], 4294965248 }
  0x48   :  { %1301 = dma.done.wait [#allocation10], 1024  }
  0x49   :  { %1302 = vsyncadd [#allocation10], 4294966272  ;;  %v1155_v0 = vld [vmem:[#allocation6] sm:$0xff]   ;;  %v1156_v1 = vld [vmem:[#allocation6 + $0x8] sm:$0xff]  }
  0x4a   :  { %1036 = vmatprep.subr.bf16.mxu0 %v1155_v0  ;;  %v1157_v2 = vld [vmem:[#allocation6 + $0x10] sm:$0xff]   ;;  %v1158_v3 = vld [vmem:[#allocation6 + $0x18] sm:$0xff]   ;;  %v1163_v4 = vld [vmem:[#allocation3] sm:$0xff]  }
  0x4b   :  { %1037 = vmatpush3.bf16.msra.mxu0 %v1155_v0  ;;  %1052 = vmatprep.mubr.bf16.mxu0 %v1163_v4  ;;  %v1159_v5 = vld [vmem:[#allocation6 + $0x20] sm:$0xff]   ;;  %v1160_v6 = vld [vmem:[#allocation6 + $0x28] sm:$0xff]   ;;  %v1161_v9 = vld [vmem:[#allocation6 + $0x30] sm:$0xff]  }
  0x4c   :  { %1038 = vmatprep.subr.bf16.mxu0 %v1156_v1  ;;  %v1171_v7 = vld [vmem:[#allocation8] sm:$0xff]   ;;  %v1172_v8 = vld [vmem:[#allocation8 + $0x8] sm:$0xff]   ;;  %v1173_v10 = vld [vmem:[#allocation8 + $0x10] sm:$0xff]  }
  0x4d   :  { %1068 = vmatprep.subr.bf16.mxu1 %v1171_v7  ;;  %v1162_v11 = vld [vmem:[#allocation6 + $0x38] sm:$0xff]   ;;  %v1175_v13 = vld [vmem:[#allocation8 + $0x20] sm:$0xff]   ;;  %v1164_v14 = vld [vmem:[#allocation3 + $0x8] sm:$0xff]  }
  0x4e   :  { %1069 = vmatpush3.bf16.msra.mxu1 %v1171_v7  ;;  %v1174_v12 = vld [vmem:[#allocation8 + $0x18] sm:$0xff]   ;;  %v1165_v15 = vld [vmem:[#allocation3 + $0x10] sm:$0xff]   ;;  %v1176_v16 = vld [vmem:[#allocation8 + $0x28] sm:$0xff]  }
  0x4f   :  { %1039 = vmatpush3.bf16.msra.mxu0 %v1156_v1  ;;  %1070 = vmatprep.subr.bf16.mxu1 %v1172_v8  ;;  %v1177_v17 = vld [vmem:[#allocation8 + $0x30] sm:$0xff]   ;;  %v1166_v18 = vld [vmem:[#allocation3 + $0x18] sm:$0xff]   ;;  %v1167_v19 = vld [vmem:[#allocation3 + $0x20] sm:$0xff]  }
  0x50   :  { %1040 = vmatprep.subr.bf16.mxu0 %v1157_v2  ;;  %v1168_v20 = vld [vmem:[#allocation3 + $0x28] sm:$0xff]   ;;  %v1169_v21 = vld [vmem:[#allocation3 + $0x30] sm:$0xff]   ;;  %v1170_v22 = vld [vmem:[#allocation3 + $0x38] sm:$0xff]  }
  0x51   :  { %v1178_v23 = vld [vmem:[#allocation8 + $0x38] sm:$0xff]   ;;  %v1179_v24 = vld [vmem:[#allocation9] sm:$0xff]   ;;  %v1180_v25 = vld [vmem:[#allocation9 + $0x8] sm:$0xff]  }
  0x52   :  { %1071 = vmatpush3.bf16.msra.mxu1 %v1172_v8  ;;  %v1181_v26 = vld [vmem:[#allocation9 + $0x10] sm:$0xff]   ;;  %v1182_v27 = vld [vmem:[#allocation9 + $0x18] sm:$0xff]   ;;  %v1183_v28 = vld [vmem:[#allocation9 + $0x20] sm:$0xff]  }
  0x53   :  { %1041 = vmatpush3.bf16.msra.mxu0 %v1157_v2  ;;  %1072 = vmatprep.subr.bf16.mxu1 %v1173_v10  ;;  %v1184_v29 = vld [vmem:[#allocation9 + $0x28] sm:$0xff]   ;;  %v1185_v54 = vld [vmem:[#allocation9 + $0x30] sm:$0xff]   ;;  %v1186_v55 = vld [vmem:[#allocation9 + $0x38] sm:$0xff]  }
  0x54   :  { %1042 = vmatprep.subr.bf16.mxu0 %v1158_v3  ;;  %v891_v56 = vld [vmem:[%s1445_s3] ss:$0 sm:$0xff] }
  0x56   :  { %1073 = vmatpush3.bf16.msra.mxu1 %v1173_v10 }
  0x57   :  { %1043 = vmatpush3.bf16.msra.mxu0 %v1158_v3  ;;  %1074 = vmatprep.subr.bf16.mxu1 %v1174_v12 }
  0x58   :  { %1044 = vmatprep.subr.bf16.mxu0 %v1159_v5 }
  0x5a   :  { %1075 = vmatpush3.bf16.msra.mxu1 %v1174_v12 }
  0x5b   :  { %1045 = vmatpush3.bf16.msra.mxu0 %v1159_v5  ;;  %1076 = vmatprep.subr.bf16.mxu1 %v1175_v13 }
  0x5c   :  { %1046 = vmatprep.subr.bf16.mxu0 %v1160_v6 }
  0x5e   :  { %1077 = vmatpush3.bf16.msra.mxu1 %v1175_v13 }
  0x5f   :  { %1047 = vmatpush3.bf16.msra.mxu0 %v1160_v6  ;;  %1078 = vmatprep.subr.bf16.mxu1 %v1176_v16 }
  0x60   :  { %1048 = vmatprep.subr.bf16.mxu0 %v1161_v9 }
  0x62   :  { %1079 = vmatpush3.bf16.msra.mxu1 %v1176_v16 }
  0x63   :  { %1049 = vmatpush3.bf16.msra.mxu0 %v1161_v9  ;;  %1080 = vmatprep.subr.bf16.mxu1 %v1177_v17 }
  0x64   :  { %1050 = vmatprep.subr.bf16.mxu0 %v1162_v11 }
  0x66   :  { %1081 = vmatpush3.bf16.msra.mxu1 %v1177_v17 }
  0x67   :  { %1051 = vmatpush3.bf16.msra.mxu0 %v1162_v11  ;;  %1082 = vmatprep.subr.bf16.mxu1 %v1178_v23 }
  0x68   :  { %1100 = vmatprep.subr.bf16.mxu0 %v1179_v24 }
  0x6a   :  { %1053 = vmatmul.mubr.bf16.vlgmr.msra.gmra.mrb[0].mxu0 %v1164_v14  ;;  %1083 = vmatpush3.bf16.msra.mxu1 %v1178_v23 }
  0x6b   :  { %1056 = vmatprep.mubr.bf16.mxu0 %v1165_v15  ;;  %1132 = vmatprep.subr.bf16.mxu1 %v1179_v24 }
  0x6c   :  { %1101 = vmatpush3.bf16.msra.mxu0 %v1179_v24 }
  0x6d   :  { %1102 = vmatprep.subr.bf16.mxu0 %v1180_v25 }
  0x70   :  { %1103 = vmatpush3.bf16.msra.mxu0 %v1180_v25 }
  0x71   :  { %1104 = vmatprep.subr.bf16.mxu0 %v1181_v26 }
  0x72   :  { %1057 = vmatmul.mubr.bf16.gmra.mrb[4].mxu0 %v1166_v18 }
  0x73   :  { %1060 = vmatprep.mubr.bf16.mxu0 %v1167_v19 }
  0x74   :  { %1105 = vmatpush3.bf16.msra.mxu0 %v1181_v26 }
  0x75   :  { %1106 = vmatprep.subr.bf16.mxu0 %v1182_v27 }
  0x78   :  { %1107 = vmatpush3.bf16.msra.mxu0 %v1182_v27 }
  0x79   :  { %1108 = vmatprep.subr.bf16.mxu0 %v1183_v28 }
  0x7a   :  { %1061 = vmatmul.mubr.bf16.gmra.mrb[8].mxu0 %v1168_v20 }
  0x7b   :  { %1064 = vmatprep.mubr.bf16.mxu0 %v1169_v21 }
  0x7c   :  { %1109 = vmatpush3.bf16.msra.mxu0 %v1183_v28 }
  0x7d   :  { %1110 = vmatprep.subr.bf16.mxu0 %v1184_v29 }
  0x80   :  { %1111 = vmatpush3.bf16.msra.mxu0 %v1184_v29 }
  0x81   :  { %1112 = vmatprep.subr.bf16.mxu0 %v1185_v54 }
  0x82   :  { %1065 = vmatmul.mubr.bf16.gmra.mrb[12].mxu0 %v1170_v22 }
  0x84   :  { %1113 = vmatpush3.bf16.msra.mxu0 %v1185_v54 }
  0x85   :  { %1114 = vmatprep.subr.bf16.mxu0 %v1186_v55 }
  0x88   :  { %1115 = vmatpush3.bf16.msra.mxu0 %v1186_v55 }
 0x13d   :  { %v1054_v30 = vpop.f32.mrb[0].mxu0 }
 0x13e   :  { %v278_v31 = vpop.f32.mrb[1].mxu0 }
 0x13f   :  { %v1055_v32 = vpop.f32.mrb[2].mxu0 }
 0x140   :  { %v393_v33 = vpack.c.bf16 %v1055_v32, %v1054_v30  ;;  %v281_v34 = vpop.f32.mrb[3].mxu0 }
 0x141   :  { %v392_v35 = vpack.c.bf16 %v281_v34, %v278_v31 }
 0x143   :  { %1084 = vmatprep.mubr.bf16.mxu1 %v392_v35 }
 0x144   :  { %1085 = vmatmul.mubr.bf16.vlgmr.msra.gmra.mrb[0].mxu1 %v393_v33 }
 0x145   :  { %v1058_v36 = vpop.f32.mrb[4].mxu0  ;;  %1140 = vmatpush3.bf16.msra.mxu1 %v1179_v24 }
 0x146   :  { %v294_v37 = vpop.f32.mrb[5].mxu0  ;;  %1133 = vmatprep.subr.bf16.mxu1 %v1180_v25 }
 0x147   :  { %v1059_v38 = vpop.f32.mrb[6].mxu0 }
 0x148   :  { %v395_v39 = vpack.c.bf16 %v1059_v38, %v1058_v36  ;;  %v297_v40 = vpop.f32.mrb[7].mxu0 }
 0x149   :  { %v394_v41 = vpack.c.bf16 %v297_v40, %v294_v37  ;;  %1141 = vmatpush3.bf16.msra.mxu1 %v1180_v25 }
 0x14a   :  { %1134 = vmatprep.subr.bf16.mxu1 %v1181_v26 }
 0x14b   :  { %1088 = vmatprep.mubr.bf16.mxu1 %v394_v41 }
 0x14c   :  { %1089 = vmatmul.mubr.bf16.gmra.mrb[4].mxu1 %v395_v39 }
 0x14d   :  { %v1062_v42 = vpop.f32.mrb[8].mxu0  ;;  %1142 = vmatpush3.bf16.msra.mxu1 %v1181_v26 }
 0x14e   :  { %v310_v43 = vpop.f32.mrb[9].mxu0  ;;  %1135 = vmatprep.subr.bf16.mxu1 %v1182_v27 }
 0x14f   :  { %v1063_v44 = vpop.f32.mrb[10].mxu0 }
 0x150   :  { %v397_v45 = vpack.c.bf16 %v1063_v44, %v1062_v42  ;;  %v313_v46 = vpop.f32.mrb[11].mxu0 }
 0x151   :  { %v396_v47 = vpack.c.bf16 %v313_v46, %v310_v43  ;;  %1143 = vmatpush3.bf16.msra.mxu1 %v1182_v27 }
 0x152   :  { %1136 = vmatprep.subr.bf16.mxu1 %v1183_v28 }
 0x153   :  { %1092 = vmatprep.mubr.bf16.mxu1 %v396_v47 }
 0x154   :  { %1093 = vmatmul.mubr.bf16.gmra.mrb[8].mxu1 %v397_v45 }
 0x155   :  { %v1066_v48 = vpop.f32.mrb[12].mxu0  ;;  %1144 = vmatpush3.bf16.msra.mxu1 %v1183_v28 }
 0x156   :  { %v326_v49 = vpop.f32.mrb[13].mxu0  ;;  %1137 = vmatprep.subr.bf16.mxu1 %v1184_v29 }
 0x157   :  { %v1067_v50 = vpop.f32.mrb[14].mxu0 }
 0x158   :  { %v399_v51 = vpack.c.bf16 %v1067_v50, %v1066_v48  ;;  %v329_v52 = vpop.f32.mrb[15].mxu0 }
 0x159   :  { %v398_v53 = vpack.c.bf16 %v329_v52, %v326_v49  ;;  %1145 = vmatpush3.bf16.msra.mxu1 %v1184_v29  ;;  %v900_v49 = vld [vmem:[%s1447_s5] ss:$0 sm:$0xff]  ;;  %s1311_s5 = smov [#allocation11]  }
 0x15a   :  { %1138 = vmatprep.subr.bf16.mxu1 %v1185_v54  ;;  %s861_s23 = sshll.u32 %s1311_s5, 4  ;;  %s862_s23 = int_to_ptr.vmem [resolvable:$true] %s861_s23 }
 0x15b   :  { %1096 = vmatprep.mubr.bf16.mxu1 %v398_v53  ;;  %s1275_s25 = scalar_lea.vmem %s862_s23, 1024  ;;  %p1280_p5 = scmp.lt.s32.totalorder %s862_s23, %s862_s23 }
 0x15c   :  { %1097 = vmatmul.mubr.bf16.gmra.mrb[12].mxu1 %v399_v51  ;;  %p1276_p4 = scmp.ne.s32.totalorder %s862_s23, %s1275_s25  ;;  %p1281_p6 = scmp.lt.s32.totalorder %s1275_s25, %s1275_s25 }
 0x15d   :  { %1146 = vmatpush3.bf16.msra.mxu1 %v1185_v54 }
 0x15e   :  { %1139 = vmatprep.subr.bf16.mxu1 %v1186_v55  ;;  %p1282_p7 = por %p1281_p6, %p1280_p5 }
 0x160   :  { %p1283_p8 = pnand %p1282_p7, %p1276_p4 }
 0x161   :  { %1147 = vmatpush3.bf16.msra.mxu1 %v1186_v55 }
 0x217   :  { %v1086_v57 = vpop.f32.mrb[0].mxu1 }
 0x218   :  { %v514_v58 = vadd.f32 %v1086_v57, %v891_v56  ;;  %v505_v59 = vpop.f32.mrb[1].mxu1 }
 0x219   :  { %v506_v60 = vadd.f32 %v891_v56, %v505_v59  ;;  %v1087_v61 = vpop.f32.mrb[2].mxu1 }
 0x21a   :  { %v517_v62 = vadd.f32 %v1087_v61, %v891_v56  ;;  %v508_v63 = vpop.f32.mrb[3].mxu1  ;;  %v570_v1 = vmax.f32 %v514_v58, 0.0 }
 0x21b   :  { %v509_v0 = vadd.f32 %v891_v56, %v508_v63  ;;  %v568_v3 = vmax.f32 %v506_v60, 0.0 }
 0x21c   :  { %v571_v2 = vmax.f32 %v517_v62, 0.0 }
 0x21d   :  { %v569_v4 = vmax.f32 %v509_v0, 0.0 }
 0x21e   :  { %v585_v5 = vpack.c.bf16 %v571_v2, %v570_v1 }
 0x21f   :  { %v584_v6 = vpack.c.bf16 %v569_v4, %v568_v3  ;;  %v1090_v7 = vpop.f32.mrb[4].mxu1 }
 0x220   :  { %v530_v8 = vadd.f32 %v1090_v7, %v891_v56  ;;  %v521_v9 = vpop.f32.mrb[5].mxu1 }
 0x221   :  { %v522_v10 = vadd.f32 %v891_v56, %v521_v9  ;;  %v1091_v11 = vpop.f32.mrb[6].mxu1  ;;  %1116 = vmatprep.mubr.bf16.mxu0 %v584_v6 }
 0x222   :  { %v533_v12 = vadd.f32 %v1091_v11, %v891_v56  ;;  %v524_v13 = vpop.f32.mrb[7].mxu1  ;;  %1117 = vmatmul.mubr.bf16.vlgmr.msra.gmra.mrb[16].mxu0 %v585_v5  ;;  %v574_v15 = vmax.f32 %v530_v8, 0.0 }
 0x223   :  { %v525_v14 = vadd.f32 %v891_v56, %v524_v13  ;;  %v572_v17 = vmax.f32 %v522_v10, 0.0 }
 0x224   :  { %v575_v16 = vmax.f32 %v533_v12, 0.0 }
 0x225   :  { %v573_v18 = vmax.f32 %v525_v14, 0.0 }
 0x226   :  { %v587_v19 = vpack.c.bf16 %v575_v16, %v574_v15 }
 0x227   :  { %v586_v20 = vpack.c.bf16 %v573_v18, %v572_v17  ;;  %v1094_v21 = vpop.f32.mrb[8].mxu1 }
 0x228   :  { %v546_v22 = vadd.f32 %v1094_v21, %v891_v56  ;;  %v537_v23 = vpop.f32.mrb[9].mxu1 }
 0x229   :  { %v538_v24 = vadd.f32 %v891_v56, %v537_v23  ;;  %v1095_v25 = vpop.f32.mrb[10].mxu1  ;;  %1120 = vmatprep.mubr.bf16.mxu0 %v586_v20 }
 0x22a   :  { %v549_v26 = vadd.f32 %v1095_v25, %v891_v56  ;;  %v540_v27 = vpop.f32.mrb[11].mxu1  ;;  %1121 = vmatmul.mubr.bf16.gmra.mrb[20].mxu0 %v587_v19  ;;  %v578_v29 = vmax.f32 %v546_v22, 0.0 }
 0x22b   :  { %v541_v28 = vadd.f32 %v891_v56, %v540_v27  ;;  %v576_v31 = vmax.f32 %v538_v24, 0.0 }
 0x22c   :  { %v579_v30 = vmax.f32 %v549_v26, 0.0 }
 0x22d   :  { %v577_v32 = vmax.f32 %v541_v28, 0.0 }
 0x22e   :  { %v589_v33 = vpack.c.bf16 %v579_v30, %v578_v29 }
 0x22f   :  { %v588_v34 = vpack.c.bf16 %v577_v32, %v576_v31  ;;  %v1098_v35 = vpop.f32.mrb[12].mxu1 }
 0x230   :  { %v562_v36 = vadd.f32 %v1098_v35, %v891_v56  ;;  %v553_v37 = vpop.f32.mrb[13].mxu1 }
 0x231   :  { %v554_v38 = vadd.f32 %v891_v56, %v553_v37  ;;  %v1099_v39 = vpop.f32.mrb[14].mxu1  ;;  %1124 = vmatprep.mubr.bf16.mxu1 %v588_v34 }
 0x232   :  { %v565_v40 = vadd.f32 %v1099_v39, %v891_v56  ;;  %v556_v41 = vpop.f32.mrb[15].mxu1  ;;  %1125 = vmatmul.mubr.bf16.vlgmr.msra.gmra.mrb[16].mxu1 %v589_v33  ;;  %v582_v43 = vmax.f32 %v562_v36, 0.0 }
 0x233   :  { %v557_v42 = vadd.f32 %v891_v56, %v556_v41  ;;  %v580_v45 = vmax.f32 %v554_v38, 0.0 }
 0x234   :  { %v583_v44 = vmax.f32 %v565_v40, 0.0 }
 0x235   :  { %v581_v46 = vmax.f32 %v557_v42, 0.0 }
 0x236   :  { %v591_v47 = vpack.c.bf16 %v583_v44, %v582_v43 }
 0x237   :  { %v590_v48 = vpack.c.bf16 %v581_v46, %v580_v45 }
 0x239   :  { %1128 = vmatprep.mubr.bf16.mxu1 %v590_v48 }
 0x23a   :  { %1129 = vmatmul.mubr.bf16.gmra.mrb[20].mxu1 %v591_v47 }
 0x2f5   :  { %v1118_v50 = vpop.f32.mrb[16].mxu0 }
 0x2f6   :  { %v706_v51 = vadd.f32 %v1118_v50, %v900_v49  ;;  %v697_v52 = vpop.f32.mrb[17].mxu0 }
 0x2f7   :  { %v698_v53 = vadd.f32 %v900_v49, %v697_v52  ;;  %v1119_v54 = vpop.f32.mrb[18].mxu0 }
 0x2f8   :  { %v709_v55 = vadd.f32 %v1119_v54, %v900_v49  ;;  %v700_v57 = vpop.f32.mrb[19].mxu0  ;;  %v762_v58 = vmax.f32 %v706_v51, 0.0 }
 0x2f9   :  { %v701_v56 = vadd.f32 %v900_v49, %v700_v57  ;;  %v760_v60 = vmax.f32 %v698_v53, 0.0 }
 0x2fa   :  { %v763_v59 = vmax.f32 %v709_v55, 0.0 }
 0x2fb   :  { %v761_v61 = vmax.f32 %v701_v56, 0.0 }
 0x2fc   :  { %v949_v62 = vpack.c.bf16 %v763_v59, %v762_v58 }
 0x2fd   :  { %v944_v63 = vpack.c.bf16 %v761_v61, %v760_v60  ;;  %v1122_v0 = vpop.f32.mrb[20].mxu0 }
 0x2fe   :  { %981 = vst [vmem:[#allocation11 + $0x8] sm:$0xff] %v949_v62   ;;  %v722_v1 = vadd.f32 %v1122_v0, %v900_v49  ;;  %v713_v2 = vpop.f32.mrb[21].mxu0 }
 0x2ff   :  { %945 = vst [vmem:[#allocation11] sm:$0xff] %v944_v63   ;;  %v714_v3 = vadd.f32 %v900_v49, %v713_v2  ;;  %v1123_v4 = vpop.f32.mrb[22].mxu0 }
 0x300   :  { %v725_v5 = vadd.f32 %v1123_v4, %v900_v49  ;;  %v716_v6 = vpop.f32.mrb[23].mxu0  ;;  %v766_v8 = vmax.f32 %v722_v1, 0.0 }
 0x301   :  { %v717_v7 = vadd.f32 %v900_v49, %v716_v6  ;;  %v764_v10 = vmax.f32 %v714_v3, 0.0 }
 0x302   :  { %v767_v9 = vmax.f32 %v725_v5, 0.0 }
 0x303   :  { %v765_v11 = vmax.f32 %v717_v7, 0.0 }
 0x304   :  { %v959_v12 = vpack.c.bf16 %v767_v9, %v766_v8 }
 0x305   :  { %v954_v13 = vpack.c.bf16 %v765_v11, %v764_v10  ;;  %v1126_v14 = vpop.f32.mrb[16].mxu1 }
 0x306   :  { %983 = vst [vmem:[#allocation11 + $0x18] sm:$0xff] %v959_v12   ;;  %v738_v15 = vadd.f32 %v1126_v14, %v900_v49  ;;  %v729_v16 = vpop.f32.mrb[17].mxu1 }
 0x307   :  { %982 = vst [vmem:[#allocation11 + $0x10] sm:$0xff] %v954_v13   ;;  %v730_v17 = vadd.f32 %v900_v49, %v729_v16  ;;  %v1127_v18 = vpop.f32.mrb[18].mxu1 }
 0x308   :  { %v741_v19 = vadd.f32 %v1127_v18, %v900_v49  ;;  %v732_v20 = vpop.f32.mrb[19].mxu1  ;;  %v770_v22 = vmax.f32 %v738_v15, 0.0 }
 0x309   :  { %v733_v21 = vadd.f32 %v900_v49, %v732_v20  ;;  %v768_v24 = vmax.f32 %v730_v17, 0.0 }
 0x30a   :  { %v771_v23 = vmax.f32 %v741_v19, 0.0 }
 0x30b   :  { %v769_v25 = vmax.f32 %v733_v21, 0.0 }
 0x30c   :  { %v969_v26 = vpack.c.bf16 %v771_v23, %v770_v22 }
 0x30d   :  { %v964_v27 = vpack.c.bf16 %v769_v25, %v768_v24  ;;  %v1130_v28 = vpop.f32.mrb[20].mxu1 }
 0x30e   :  { %985 = vst [vmem:[#allocation11 + $0x28] sm:$0xff] %v969_v26   ;;  %v754_v29 = vadd.f32 %v1130_v28, %v900_v49  ;;  %v745_v30 = vpop.f32.mrb[21].mxu1 }
 0x30f   :  { %984 = vst [vmem:[#allocation11 + $0x20] sm:$0xff] %v964_v27   ;;  %v746_v31 = vadd.f32 %v900_v49, %v745_v30  ;;  %v1131_v32 = vpop.f32.mrb[22].mxu1 }
 0x310   :  { %v757_v33 = vadd.f32 %v1131_v32, %v900_v49  ;;  %v748_v34 = vpop.f32.mrb[23].mxu1  ;;  %v774_v36 = vmax.f32 %v754_v29, 0.0 }
 0x311   :  { %v749_v35 = vadd.f32 %v900_v49, %v748_v34  ;;  %v772_v38 = vmax.f32 %v746_v31, 0.0 }
 0x312   :  { %v775_v37 = vmax.f32 %v757_v33, 0.0 }
 0x313   :  { %v773_v39 = vmax.f32 %v749_v35, 0.0 }
 0x314   :  { %v979_v40 = vpack.c.bf16 %v775_v37, %v774_v36 }
 0x315   :  { %v974_v41 = vpack.c.bf16 %v773_v39, %v772_v38 }
 0x316   :  { %987 = vst [vmem:[#allocation11 + $0x38] sm:$0xff] %v979_v40  }
 0x317   :  { %986 = vst [vmem:[#allocation11 + $0x30] sm:$0xff] %v974_v41  }
 0x318   :  { %1286 = shalt.err (!%p1283_p8)
}
 0x319   :  { %s1287_s28 = scalar_lea.hbm %s1448_s6, 1024 }
 0x31a   :  { %p1288_p9 = scmp.ne.s32.totalorder %s1448_s6, %s1287_s28  ;;  %p1291_p10 = scmp.lt.u32.totalorder %s1287_s28, %s1448_s6 }
 0x31c   :  { %p1293_p11 = pnand %p1291_p10, %p1288_p9 }
 0x31e   :  { %1296 = shalt.err (!%p1293_p11)
}
 0x31f   :  { %867 = dma.vmem_to_hbm [thread:$0]  %s862_s23, 1024, %s1448_s6, [#allocation5], %s1307_s9, %s1307_s9, %s1308_s10  }
 0x320   :  { %1303 = dma.done.wait [#allocation5], 1024  }
 0x321   :  { %1304 = vsyncadd [#allocation5], 4294966272 }
 0x322   :  { %871 = vsyncpa [#allocation4], 1 }
 0x323   :  { %872 = vsyncpa [#allocation7], 1 }
 0x324   :  { %873 = vsyncpa [#allocation10], 1 }
 0x325   :  { %874 = vsyncpa [#allocation5], 1 }

</bundles_post_ra>
